<compile_context>
chip_gen: v6e
topology: v6e:2x2x1
jax: 0.10.0
libtpu: 0.0.40
codegen_flags: <defaults>
</compile_context>

<pallas_src>
import functools

import jax
import jax.numpy as jnp
from jax import lax
from jax.experimental import pallas as pl
from jax.experimental.pallas import tpu as pltpu

CA_SCALE = 0.042    # channel_attention_scale
SA_SCALE = 0.0625   # spatial_attention_scale
BN_EPS = 1e-5


def _sigmoid(x, approx=True):
    # exp lowers to the EUP; the reciprocal also goes to the EUP with
    # approx=True.  Very negative x: exp(-x)=inf -> 1/inf = 0 (correct limit),
    # so no NaN/overflow hazard.
    return pl.reciprocal(1.0 + jnp.exp(-x), approx=approx)


def _skip_layer_bias_kernel(xcol_ref, xres_ref, wconv_ref, gamma_ref, beta_ref,
                            w1_ref, w2_ref, wsa_ref, o_ref, *, nb, hw, cc, scale):
    nhw = nb * hw

    # ---- Conv2d(C, C, k=2*reach+1, padding=reach, bias=False) ---------------
    # Single fused MXU matmul over all K*K taps (bf16 operands, f32 accumulate).
    acc = jnp.dot(wconv_ref[...], xcol_ref[...],
                  preferred_element_type=jnp.float32)            # (C, NHW) f32

    # ---- BatchNorm2d (training-mode batch stats) ------------------------------
    # XLU lane reductions; two-pass (centered) variance for numerical safety.
    mean = jnp.sum(acc, axis=1, keepdims=True) * (1.0 / nhw)     # (C, 1)
    centered = acc - mean
    var = jnp.sum(centered * centered, axis=1, keepdims=True) * (1.0 / nhw)
    y = centered * lax.rsqrt(var + BN_EPS) * gamma_ref[...] + beta_ref[...]

    # ---- AttentionBlock: channel attention ------------------------------------
    # Per-image avg/max pools over H*W (lane reductions), one stacked fc1/fc2 MLP.
    avgs = jnp.concatenate(
        [jnp.mean(y[:, n * hw:(n + 1) * hw], axis=1, keepdims=True)
         for n in range(nb)], axis=1)                             # (C, N)
    maxs = jnp.concatenate(
        [jnp.max(y[:, n * hw:(n + 1) * hw], axis=1, keepdims=True)
         for n in range(nb)], axis=1)                             # (C, N)
    pooled = jnp.concatenate([avgs, maxs], axis=1)                # (C, 2N)
    hmid = jnp.maximum(
        jnp.dot(w1_ref[...], pooled.astype(jnp.bfloat16),
                preferred_element_type=jnp.float32), 0.0)         # (C//8, 2N)
    mlp = jnp.dot(w2_ref[...], hmid.astype(jnp.bfloat16),
                  preferred_element_type=jnp.float32)             # (C, 2N)
    ca_fac = 1.0 + CA_SCALE * (_sigmoid(mlp[:, :nb] + mlp[:, nb:]) - 1.0)  # (C, N)

    # ---- AttentionBlock: spatial attention (7x7 conv) as ONE MXU matmul -------
    # Per-image channel-mean / channel-max maps of the channel-attended
    # activations, stacked as (N, 2*HW), times the wrapper-built (2*HW, HW)
    # conv matrix (tap weights + zero-padding boundary masks folded in).
    rows = []
    for n in range(nb):
        s = y[:, n * hw:(n + 1) * hw] * ca_fac[:, n:n + 1]        # (C, HW)
        rows.append(jnp.concatenate(
            [jnp.mean(s, axis=0, keepdims=True),
             jnp.max(s, axis=0, keepdims=True)], axis=1))         # (1, 2*HW)
    maps = jnp.concatenate(rows, axis=0)                          # (N, 2*HW)
    sa = jnp.dot(maps.astype(jnp.bfloat16), wsa_ref[...],
                 preferred_element_type=jnp.float32)              # (N, HW)
    sa_fac = 1.0 + SA_SCALE * (_sigmoid(sa) - 1.0)

    # ---- residual + swish (lane-dense NCHW-flat load/store) -------------------
    # Recompute the channel-attention multiply per slab instead of keeping
    # N live (C,HW) arrays across the whole SA section (vreg pressure).
    for n in range(nb):
        att = (y[:, n * hw:(n + 1) * hw] * ca_fac[:, n:n + 1]) * sa_fac[n:n + 1, :]
        z = xres_ref[n * cc:(n + 1) * cc, :] + scale * att
        o_ref[n * cc:(n + 1) * cc, :] = z * _sigmoid(z)


def init_params(key, channels, reach):
    """Deterministic synthetic parameters (shapes follow the torch module)."""
    k = 2 * reach + 1
    c8 = channels // 8
    ks = jax.random.split(key, 4)
    return {
        "w_conv": 0.05 * jax.random.normal(ks[0], (channels, channels, k, k),
                                           jnp.float32),          # OIHW
        "gamma": 1.0 + 0.1 * jnp.arange(channels, dtype=jnp.float32) / channels,
        "beta": 0.01 * jnp.arange(channels, dtype=jnp.float32),
        "w1": 0.2 * jax.random.normal(ks[1], (c8, channels), jnp.float32),  # fc1
        "w2": 0.2 * jax.random.normal(ks[2], (channels, c8), jnp.float32),  # fc2
        "w7": 0.05 * jax.random.normal(ks[3], (2 * 7 * 7,), jnp.float32),   # (1,2,7,7) flat
    }


def skip_layer_bias(x_nchw, params, *, reach, scale=1.0):
    x = x_nchw.astype(jnp.float32)
    N, C, H, W = x.shape
    K = 2 * reach + 1
    HW = H * W
    NHW = N * HW

    # --- glue (plain XLA): transposed im2col, feature-major rows --------------
    # TODO(synk): move im2col in-kernel at production sizes (~K^2 HBM cut).
    xpad = jnp.pad(x, ((0, 0), (0, 0), (reach, reach), (reach, reach)))
    cols = [jnp.transpose(xpad[:, :, ky:ky + H, kx:kx + W], (1, 0, 2, 3)
                          ).reshape(C, NHW)
            for ky in range(K) for kx in range(K)]
    xcol_t = jnp.concatenate(cols, axis=0).astype(jnp.bfloat16)   # (K*K*C, NHW)
    xres_t = x.reshape(N * C, HW)                                 # NCHW-flat

    w_t = jnp.transpose(params["w_conv"], (0, 2, 3, 1)
                        ).reshape(C, K * K * C).astype(jnp.bfloat16)  # (C, KK*C)
    gamma = params["gamma"].reshape(C, 1)
    beta = params["beta"].reshape(C, 1)
    w1 = params["w1"].astype(jnp.bfloat16)                        # (C//8, C)
    w2 = params["w2"].astype(jnp.bfloat16)                        # (C, C//8)

    # --- glue: spatial-attention conv matrix (2*HW, HW) ------------------------
    # Wsa[pin, pout] (mean block) / Wsa[HW+pin, pout] (max block) holds the 7x7
    # tap weight mapping input pixel pin -> output pixel pout; zero-padding
    # boundary handling is folded in (invalid taps simply contribute nothing).
    w7 = params["w7"].reshape(2, 7, 7)
    pout = jnp.arange(HW)
    ho, wo = pout // W, pout % W
    pin_rows = jnp.arange(HW)
    wsa_mean = jnp.zeros((HW, HW), jnp.float32)
    wsa_max = jnp.zeros((HW, HW), jnp.float32)
    for ky in range(7):
        dy = ky - 3
        for kx in range(7):
            dx = kx - 3
            hi, wi = ho + dy, wo + dx
            valid = (hi >= 0) & (hi < H) & (wi >= 0) & (wi < W)
            pin = jnp.where(valid, hi * W + wi, -1)               # -1 never matches
            scatter = (pin_rows[:, None] == pin[None, :]).astype(jnp.float32)
            wsa_mean = wsa_mean + w7[0, ky, kx] * scatter
            wsa_max = wsa_max + w7[1, ky, kx] * scatter
    wsa = jnp.concatenate([wsa_mean, wsa_max], axis=0).astype(jnp.bfloat16)  # (2*HW, HW)

    vmem = pl.BlockSpec(memory_space=pltpu.MemorySpace.VMEM)

    out = pl.pallas_call(
        functools.partial(_skip_layer_bias_kernel,
                          nb=N, hw=HW, cc=C, scale=float(scale)),
        out_shape=jax.ShapeDtypeStruct((N * C, HW), jnp.float32),
        in_specs=[vmem] * 8,
        out_specs=vmem,
        # All buffers (incl. the 256 KiB SA matrix) total well under 1 MiB;
        # 16 MiB stays far below every generation's physical VMEM (v7x incl.).
        compiler_params=pltpu.CompilerParams(vmem_limit_bytes=16 * 1024 * 1024),
    )(xcol_t, xres_t, w_t, gamma, beta, w1, w2, wsa)

    return out.reshape(N, C, H, W)


def _reference(x_nchw, params, *, reach, scale=1.0):
    """Pure-JAX f32 reference of the torch forward (training-mode BN)."""
    x = x_nchw.astype(jnp.float32)
    N, C, H, W = x.shape
    y = lax.conv_general_dilated(x, params["w_conv"], (1, 1),
                                 [(reach, reach), (reach, reach)],
                                 dimension_numbers=("NCHW", "OIHW", "NCHW"))
    mean = jnp.mean(y, axis=(0, 2, 3), keepdims=True)
    var = jnp.mean((y - mean) ** 2, axis=(0, 2, 3), keepdims=True)
    y = ((y - mean) / jnp.sqrt(var + BN_EPS)
         * params["gamma"].reshape(1, C, 1, 1) + params["beta"].reshape(1, C, 1, 1))

    avg_p = jnp.mean(y, axis=(2, 3))
    max_p = jnp.max(y, axis=(2, 3))

    def mlp(v):  # fc weights are (out, in)
        return jnp.maximum(v @ params["w1"].T, 0.0) @ params["w2"].T

    ca = jax.nn.sigmoid(mlp(avg_p) + mlp(max_p))
    y = y * (1.0 + CA_SCALE * (ca - 1.0))[:, :, None, None]

    avg_c = jnp.mean(y, axis=1, keepdims=True)
    max_c = jnp.max(y, axis=1, keepdims=True)
    inp = jnp.concatenate([avg_c, max_c], axis=1)
    w7 = params["w7"].reshape(1, 2, 7, 7)
    sa = lax.conv_general_dilated(inp, w7, (1, 1), [(3, 3), (3, 3)],
                                  dimension_numbers=("NCHW", "OIHW", "NCHW"))
    sa = jax.nn.sigmoid(sa)
    y = y * (1.0 + SA_SCALE * (sa - 1.0))
    z = x + scale * y
    return z * jax.nn.sigmoid(z)


if __name__ == "__main__":
    key = jax.random.PRNGKey(0)
    kx, kp = jax.random.split(key)
    N, C, H, W = 2, 16, 16, 16     # channels=16 -> fc bottleneck 16//8 = 2
    reach = 1                      # conv kernel 3x3, padding 1
    scale = 1.0

    x = jax.random.normal(kx, (N, C, H, W), jnp.float32)
    params = init_params(kp, C, reach)

    out = skip_layer_bias(x, params, reach=reach, scale=scale)
    out = jax.block_until_ready(out)
    assert out.shape == (N, C, H, W), out.shape

    ref = _reference(x, params, reach=reach, scale=scale)
    err = float(jnp.max(jnp.abs(out - ref)))
    # Kernel uses bf16 MXU operands (conv, attention MLP, SA conv matrix) and
    # approx EUP reciprocals vs. the pure-f32 reference; expected max deviation
    # ~1e-2, so 3e-2 is a safe bound.
    assert err < 3e-2, f"max abs error too large: {err}"

    print("KERNEL_OK")
</pallas_src>

<mosaic_0001>
module attributes {stable_mosaic.version = 11 : i64} {
  func.func @_skip_layer_bias_kernel(%arg0: memref<144x512xbf16, #tpu.memory_space<vmem>>, %arg1: memref<32x256xf32, #tpu.memory_space<vmem>>, %arg2: memref<16x144xbf16, #tpu.memory_space<vmem>>, %arg3: memref<16x1xf32, #tpu.memory_space<vmem>>, %arg4: memref<16x1xf32, #tpu.memory_space<vmem>>, %arg5: memref<2x16xbf16, #tpu.memory_space<vmem>>, %arg6: memref<16x2xbf16, #tpu.memory_space<vmem>>, %arg7: memref<512x256xbf16, #tpu.memory_space<vmem>>, %arg8: memref<32x256xf32, #tpu.memory_space<vmem>>) attributes {dimension_semantics = [], scalar_prefetch = 0 : i64, scratch_operands = 0 : i64, tpu.core_type = #tpu.core_type<tc>} {
    %c0 = arith.constant 0 : index
    %c0_0 = arith.constant 0 : index
    %0 = vector.load %arg2[%c0, %c0_0] : memref<16x144xbf16, #tpu.memory_space<vmem>>, vector<16x144xbf16>
    %c0_1 = arith.constant 0 : index
    %c0_2 = arith.constant 0 : index
    %1 = vector.load %arg0[%c0_1, %c0_2] : memref<144x512xbf16, #tpu.memory_space<vmem>>, vector<144x512xbf16>
    %cst = arith.constant dense<0.000000e+00> : vector<16x512xf32>
    %2 = tpu.matmul %0, %1, %cst {dimension_numbers = #tpu.dot_dimension_numbers<[1], [0], [0], [1], [0, 0, 1, 1], [], []>} : vector<16x144xbf16>, vector<144x512xbf16>, vector<16x512xf32> -> vector<16x512xf32>
    %cst_3 = arith.constant dense<0.000000e+00> : vector<16xf32>
    %3 = vector.multi_reduction <add>, %2, %cst_3 [1] : vector<16x512xf32> to vector<16xf32>
    %4 = vector.shape_cast %3 : vector<16xf32> to vector<16x1xf32>
    %cst_4 = arith.constant 0.001953125 : f32
    %5 = vector.broadcast %cst_4 : f32 to vector<16x1xf32>
    %6 = arith.mulf %4, %5 : vector<16x1xf32>
    %7 = vector.broadcast %6 : vector<16x1xf32> to vector<16x512xf32>
    %8 = arith.subf %2, %7 : vector<16x512xf32>
    %9 = arith.mulf %8, %8 : vector<16x512xf32>
    %cst_5 = arith.constant dense<0.000000e+00> : vector<16xf32>
    %10 = vector.multi_reduction <add>, %9, %cst_5 [1] : vector<16x512xf32> to vector<16xf32>
    %11 = vector.shape_cast %10 : vector<16xf32> to vector<16x1xf32>
    %cst_6 = arith.constant 0.001953125 : f32
    %12 = vector.broadcast %cst_6 : f32 to vector<16x1xf32>
    %13 = arith.mulf %11, %12 : vector<16x1xf32>
    %cst_7 = arith.constant 9.99999974E-6 : f32
    %14 = vector.broadcast %cst_7 : f32 to vector<16x1xf32>
    %15 = arith.addf %13, %14 : vector<16x1xf32>
    %16 = math.rsqrt %15 : vector<16x1xf32>
    %17 = vector.broadcast %16 : vector<16x1xf32> to vector<16x512xf32>
    %18 = arith.mulf %8, %17 : vector<16x512xf32>
    %c0_8 = arith.constant 0 : index
    %c0_9 = arith.constant 0 : index
    %19 = vector.load %arg3[%c0_8, %c0_9] : memref<16x1xf32, #tpu.memory_space<vmem>>, vector<16x1xf32>
    %20 = vector.broadcast %19 : vector<16x1xf32> to vector<16x512xf32>
    %21 = arith.mulf %18, %20 : vector<16x512xf32>
    %c0_10 = arith.constant 0 : index
    %c0_11 = arith.constant 0 : index
    %22 = vector.load %arg4[%c0_10, %c0_11] : memref<16x1xf32, #tpu.memory_space<vmem>>, vector<16x1xf32>
    %23 = vector.broadcast %22 : vector<16x1xf32> to vector<16x512xf32>
    %24 = arith.addf %21, %23 : vector<16x512xf32>
    %25 = vector.extract_strided_slice %24 {offsets = [0, 0], sizes = [16, 256], strides = [1, 1]} : vector<16x512xf32> to vector<16x256xf32>
    %cst_12 = arith.constant dense<0.000000e+00> : vector<16xf32>
    %26 = vector.multi_reduction <add>, %25, %cst_12 [1] : vector<16x256xf32> to vector<16xf32>
    %27 = vector.shape_cast %26 : vector<16xf32> to vector<16x1xf32>
    %cst_13 = arith.constant 2.560000e+02 : f32
    %28 = vector.broadcast %cst_13 : f32 to vector<16x1xf32>
    %29 = arith.divf %27, %28 : vector<16x1xf32>
    %30 = vector.extract_strided_slice %24 {offsets = [0, 256], sizes = [16, 256], strides = [1, 1]} : vector<16x512xf32> to vector<16x256xf32>
    %cst_14 = arith.constant dense<0.000000e+00> : vector<16xf32>
    %31 = vector.multi_reduction <add>, %30, %cst_14 [1] : vector<16x256xf32> to vector<16xf32>
    %32 = vector.shape_cast %31 : vector<16xf32> to vector<16x1xf32>
    %cst_15 = arith.constant 2.560000e+02 : f32
    %33 = vector.broadcast %cst_15 : f32 to vector<16x1xf32>
    %34 = arith.divf %32, %33 : vector<16x1xf32>
    %35 = tpu.concatenate %29, %34 in 1 : vector<16x1xf32>, vector<16x1xf32> -> vector<16x2xf32>
    %36 = vector.extract_strided_slice %24 {offsets = [0, 0], sizes = [16, 256], strides = [1, 1]} : vector<16x512xf32> to vector<16x256xf32>
    %cst_16 = arith.constant dense<0xFF800000> : vector<16xf32>
    %37 = vector.multi_reduction <maximumf>, %36, %cst_16 [1] : vector<16x256xf32> to vector<16xf32>
    %38 = vector.shape_cast %37 : vector<16xf32> to vector<16x1xf32>
    %39 = vector.extract_strided_slice %24 {offsets = [0, 256], sizes = [16, 256], strides = [1, 1]} : vector<16x512xf32> to vector<16x256xf32>
    %cst_17 = arith.constant dense<0xFF800000> : vector<16xf32>
    %40 = vector.multi_reduction <maximumf>, %39, %cst_17 [1] : vector<16x256xf32> to vector<16xf32>
    %41 = vector.shape_cast %40 : vector<16xf32> to vector<16x1xf32>
    %42 = tpu.concatenate %38, %41 in 1 : vector<16x1xf32>, vector<16x1xf32> -> vector<16x2xf32>
    %43 = tpu.concatenate %35, %42 in 1 : vector<16x2xf32>, vector<16x2xf32> -> vector<16x4xf32>
    %c0_18 = arith.constant 0 : index
    %c0_19 = arith.constant 0 : index
    %44 = vector.load %arg5[%c0_18, %c0_19] : memref<2x16xbf16, #tpu.memory_space<vmem>>, vector<2x16xbf16>
    %45 = arith.truncf %43 : vector<16x4xf32> to vector<16x4xbf16>
    %cst_20 = arith.constant dense<0.000000e+00> : vector<2x4xf32>
    %46 = tpu.matmul %44, %45, %cst_20 {dimension_numbers = #tpu.dot_dimension_numbers<[1], [0], [0], [1], [0, 0, 1, 1], [], []>} : vector<2x16xbf16>, vector<16x4xbf16>, vector<2x4xf32> -> vector<2x4xf32>
    %cst_21 = arith.constant 0.000000e+00 : f32
    %47 = vector.broadcast %cst_21 : f32 to vector<2x4xf32>
    %48 = arith.maximumf %46, %47 : vector<2x4xf32>
    %c0_22 = arith.constant 0 : index
    %c0_23 = arith.constant 0 : index
    %49 = vector.load %arg6[%c0_22, %c0_23] : memref<16x2xbf16, #tpu.memory_space<vmem>>, vector<16x2xbf16>
    %50 = arith.truncf %48 : vector<2x4xf32> to vector<2x4xbf16>
    %cst_24 = arith.constant dense<0.000000e+00> : vector<16x4xf32>
    %51 = tpu.matmul %49, %50, %cst_24 {dimension_numbers = #tpu.dot_dimension_numbers<[1], [0], [0], [1], [0, 0, 1, 1], [], []>} : vector<16x2xbf16>, vector<2x4xbf16>, vector<16x4xf32> -> vector<16x4xf32>
    %52 = vector.extract_strided_slice %51 {offsets = [0, 0], sizes = [16, 2], strides = [1, 1]} : vector<16x4xf32> to vector<16x2xf32>
    %53 = vector.extract_strided_slice %51 {offsets = [0, 2], sizes = [16, 2], strides = [1, 1]} : vector<16x4xf32> to vector<16x2xf32>
    %54 = arith.addf %52, %53 : vector<16x2xf32>
    %cst_25 = arith.constant 0.000000e+00 : f32
    %55 = vector.broadcast %cst_25 : f32 to vector<16x2xf32>
    %56 = arith.subf %55, %54 : vector<16x2xf32>
    %57 = math.exp %56 : vector<16x2xf32>
    %cst_26 = arith.constant 1.000000e+00 : f32
    %58 = vector.broadcast %cst_26 : f32 to vector<16x2xf32>
    %59 = arith.addf %58, %57 : vector<16x2xf32>
    %60 = tpu.reciprocal %59 {approx = true} : vector<16x2xf32> -> vector<16x2xf32>
    %cst_27 = arith.constant 1.000000e+00 : f32
    %61 = vector.broadcast %cst_27 : f32 to vector<16x2xf32>
    %62 = arith.subf %60, %61 : vector<16x2xf32>
    %cst_28 = arith.constant 4.200000e-02 : f32
    %63 = vector.broadcast %cst_28 : f32 to vector<16x2xf32>
    %64 = arith.mulf %63, %62 : vector<16x2xf32>
    %cst_29 = arith.constant 1.000000e+00 : f32
    %65 = vector.broadcast %cst_29 : f32 to vector<16x2xf32>
    %66 = arith.addf %65, %64 : vector<16x2xf32>
    %67 = vector.extract_strided_slice %24 {offsets = [0, 0], sizes = [16, 256], strides = [1, 1]} : vector<16x512xf32> to vector<16x256xf32>
    %68 = vector.extract_strided_slice %66 {offsets = [0, 0], sizes = [16, 1], strides = [1, 1]} : vector<16x2xf32> to vector<16x1xf32>
    %69 = vector.broadcast %68 : vector<16x1xf32> to vector<16x256xf32>
    %70 = arith.mulf %67, %69 : vector<16x256xf32>
    %cst_30 = arith.constant dense<0.000000e+00> : vector<256xf32>
    %71 = vector.multi_reduction <add>, %70, %cst_30 [0] : vector<16x256xf32> to vector<256xf32>
    %72 = vector.shape_cast %71 : vector<256xf32> to vector<1x256xf32>
    %cst_31 = arith.constant 1.600000e+01 : f32
    %73 = vector.broadcast %cst_31 : f32 to vector<1x256xf32>
    %74 = arith.divf %72, %73 : vector<1x256xf32>
    %cst_32 = arith.constant dense<0xFF800000> : vector<256xf32>
    %75 = vector.multi_reduction <maximumf>, %70, %cst_32 [0] : vector<16x256xf32> to vector<256xf32>
    %76 = vector.shape_cast %75 : vector<256xf32> to vector<1x256xf32>
    %77 = tpu.concatenate %74, %76 in 1 : vector<1x256xf32>, vector<1x256xf32> -> vector<1x512xf32>
    %78 = vector.extract_strided_slice %24 {offsets = [0, 256], sizes = [16, 256], strides = [1, 1]} : vector<16x512xf32> to vector<16x256xf32>
    %79 = vector.extract_strided_slice %66 {offsets = [0, 1], sizes = [16, 1], strides = [1, 1]} : vector<16x2xf32> to vector<16x1xf32>
    %80 = vector.broadcast %79 : vector<16x1xf32> to vector<16x256xf32>
    %81 = arith.mulf %78, %80 : vector<16x256xf32>
    %cst_33 = arith.constant dense<0.000000e+00> : vector<256xf32>
    %82 = vector.multi_reduction <add>, %81, %cst_33 [0] : vector<16x256xf32> to vector<256xf32>
    %83 = vector.shape_cast %82 : vector<256xf32> to vector<1x256xf32>
    %cst_34 = arith.constant 1.600000e+01 : f32
    %84 = vector.broadcast %cst_34 : f32 to vector<1x256xf32>
    %85 = arith.divf %83, %84 : vector<1x256xf32>
    %cst_35 = arith.constant dense<0xFF800000> : vector<256xf32>
    %86 = vector.multi_reduction <maximumf>, %81, %cst_35 [0] : vector<16x256xf32> to vector<256xf32>
    %87 = vector.shape_cast %86 : vector<256xf32> to vector<1x256xf32>
    %88 = tpu.concatenate %85, %87 in 1 : vector<1x256xf32>, vector<1x256xf32> -> vector<1x512xf32>
    %89 = tpu.concatenate %77, %88 in 0 : vector<1x512xf32>, vector<1x512xf32> -> vector<2x512xf32>
    %90 = arith.truncf %89 : vector<2x512xf32> to vector<2x512xbf16>
    %c0_36 = arith.constant 0 : index
    %c0_37 = arith.constant 0 : index
    %91 = vector.load %arg7[%c0_36, %c0_37] : memref<512x256xbf16, #tpu.memory_space<vmem>>, vector<512x256xbf16>
    %cst_38 = arith.constant dense<0.000000e+00> : vector<2x256xf32>
    %92 = tpu.matmul %90, %91, %cst_38 {dimension_numbers = #tpu.dot_dimension_numbers<[1], [0], [0], [1], [0, 0, 1, 1], [], []>} : vector<2x512xbf16>, vector<512x256xbf16>, vector<2x256xf32> -> vector<2x256xf32>
    %cst_39 = arith.constant 0.000000e+00 : f32
    %93 = vector.broadcast %cst_39 : f32 to vector<2x256xf32>
    %94 = arith.subf %93, %92 : vector<2x256xf32>
    %95 = math.exp %94 : vector<2x256xf32>
    %cst_40 = arith.constant 1.000000e+00 : f32
    %96 = vector.broadcast %cst_40 : f32 to vector<2x256xf32>
    %97 = arith.addf %96, %95 : vector<2x256xf32>
    %98 = tpu.reciprocal %97 {approx = true} : vector<2x256xf32> -> vector<2x256xf32>
    %cst_41 = arith.constant 1.000000e+00 : f32
    %99 = vector.broadcast %cst_41 : f32 to vector<2x256xf32>
    %100 = arith.subf %98, %99 : vector<2x256xf32>
    %cst_42 = arith.constant 6.250000e-02 : f32
    %101 = vector.broadcast %cst_42 : f32 to vector<2x256xf32>
    %102 = arith.mulf %101, %100 : vector<2x256xf32>
    %cst_43 = arith.constant 1.000000e+00 : f32
    %103 = vector.broadcast %cst_43 : f32 to vector<2x256xf32>
    %104 = arith.addf %103, %102 : vector<2x256xf32>
    %105 = vector.extract_strided_slice %24 {offsets = [0, 0], sizes = [16, 256], strides = [1, 1]} : vector<16x512xf32> to vector<16x256xf32>
    %106 = vector.extract_strided_slice %66 {offsets = [0, 0], sizes = [16, 1], strides = [1, 1]} : vector<16x2xf32> to vector<16x1xf32>
    %107 = vector.broadcast %106 : vector<16x1xf32> to vector<16x256xf32>
    %108 = arith.mulf %105, %107 : vector<16x256xf32>
    %109 = vector.extract_strided_slice %104 {offsets = [0, 0], sizes = [1, 256], strides = [1, 1]} : vector<2x256xf32> to vector<1x256xf32>
    %110 = vector.broadcast %109 : vector<1x256xf32> to vector<16x256xf32>
    %111 = arith.mulf %108, %110 : vector<16x256xf32>
    %c0_44 = arith.constant 0 : index
    %c0_45 = arith.constant 0 : index
    %112 = vector.load %arg1[%c0_44, %c0_45] : memref<32x256xf32, #tpu.memory_space<vmem>>, vector<16x256xf32>
    %cst_46 = arith.constant 1.000000e+00 : f32
    %113 = vector.broadcast %cst_46 : f32 to vector<16x256xf32>
    %114 = arith.mulf %113, %111 : vector<16x256xf32>
    %115 = arith.addf %112, %114 : vector<16x256xf32>
    %cst_47 = arith.constant 0.000000e+00 : f32
    %116 = vector.broadcast %cst_47 : f32 to vector<16x256xf32>
    %117 = arith.subf %116, %115 : vector<16x256xf32>
    %118 = math.exp %117 : vector<16x256xf32>
    %cst_48 = arith.constant 1.000000e+00 : f32
    %119 = vector.broadcast %cst_48 : f32 to vector<16x256xf32>
    %120 = arith.addf %119, %118 : vector<16x256xf32>
    %121 = tpu.reciprocal %120 {approx = true} : vector<16x256xf32> -> vector<16x256xf32>
    %122 = arith.mulf %115, %121 : vector<16x256xf32>
    %c0_49 = arith.constant 0 : index
    %c0_50 = arith.constant 0 : index
    %123 = vector.load %arg8[%c0_49, %c0_50] : memref<32x256xf32, #tpu.memory_space<vmem>>, vector<16x256xf32>
    tpu.vector_store %arg8[%c0_49, %c0_50], %122 {strides = array<i32>} : memref<32x256xf32, #tpu.memory_space<vmem>>, vector<16x256xf32>,
    %124 = vector.extract_strided_slice %24 {offsets = [0, 256], sizes = [16, 256], strides = [1, 1]} : vector<16x512xf32> to vector<16x256xf32>
    %125 = vector.extract_strided_slice %66 {offsets = [0, 1], sizes = [16, 1], strides = [1, 1]} : vector<16x2xf32> to vector<16x1xf32>
    %126 = vector.broadcast %125 : vector<16x1xf32> to vector<16x256xf32>
    %127 = arith.mulf %124, %126 : vector<16x256xf32>
    %128 = vector.extract_strided_slice %104 {offsets = [1, 0], sizes = [1, 256], strides = [1, 1]} : vector<2x256xf32> to vector<1x256xf32>
    %129 = vector.broadcast %128 : vector<1x256xf32> to vector<16x256xf32>
    %130 = arith.mulf %127, %129 : vector<16x256xf32>
    %c16 = arith.constant 16 : index
    %c0_51 = arith.constant 0 : index
    %131 = vector.load %arg1[%c16, %c0_51] : memref<32x256xf32, #tpu.memory_space<vmem>>, vector<16x256xf32>
    %cst_52 = arith.constant 1.000000e+00 : f32
    %132 = vector.broadcast %cst_52 : f32 to vector<16x256xf32>
    %133 = arith.mulf %132, %130 : vector<16x256xf32>
    %134 = arith.addf %131, %133 : vector<16x256xf32>
    %cst_53 = arith.constant 0.000000e+00 : f32
    %135 = vector.broadcast %cst_53 : f32 to vector<16x256xf32>
    %136 = arith.subf %135, %134 : vector<16x256xf32>
    %137 = math.exp %136 : vector<16x256xf32>
    %cst_54 = arith.constant 1.000000e+00 : f32
    %138 = vector.broadcast %cst_54 : f32 to vector<16x256xf32>
    %139 = arith.addf %138, %137 : vector<16x256xf32>
    %140 = tpu.reciprocal %139 {approx = true} : vector<16x256xf32> -> vector<16x256xf32>
    %141 = arith.mulf %134, %140 : vector<16x256xf32>
    %c16_55 = arith.constant 16 : index
    %c0_56 = arith.constant 0 : index
    %142 = vector.load %arg8[%c16_55, %c0_56] : memref<32x256xf32, #tpu.memory_space<vmem>>, vector<16x256xf32>
    tpu.vector_store %arg8[%c16_55, %c0_56], %141 {strides = array<i32>} : memref<32x256xf32, #tpu.memory_space<vmem>>, vector<16x256xf32>,
    return
  }
}

</mosaic_0001>

<bundles_post_ra>
// kernel: tpu_custom_call.1
= control target key start
LH: loop header
LB: loop body
LE: loop exit
PB: predicated region body
PF: predicated region fallthrough
CT: control target
= control target key end

     0   :  { %13 = vsyncpa [#allocation3], 0  ;;  %s2044_s0 = inlined_call_operand.hbm [shape: bf16[144,512], index: 0, kind: input, shape index: {}]   ;;  %s2045_s1 = inlined_call_operand.hbm [shape: f32[32,256], index: 1, kind: input, shape index: {}]   ;;  %s2046_s2 = inlined_call_operand.vmem [shape: bf16[16,144], index: 2, kind: input, shape index: {}]   ;;  %s2047_s3 = inlined_call_operand.vmem [shape: f32[16,1], index: 3, kind: input, shape index: {}]   ;;  %s2048_s4 = inlined_call_operand.vmem [shape: f32[16,1], index: 4, kind: input, shape index: {}]   ;;  %s2049_s5 = inlined_call_operand.vmem [shape: bf16[2,16], index: 5, kind: input, shape index: {}]   ;;  %s2050_s6 = inlined_call_operand.vmem [shape: bf16[16,2], index: 6, kind: input, shape index: {}]   ;;  %s2051_s7 = inlined_call_operand.hbm [shape: bf16[512,256], index: 7, kind: input, shape index: {}]   ;;  %s2052_s8 = inlined_call_operand.hbm [shape: f32[32,256], index: 8, kind: output, shape index: {}]  }
   0x1   :  { %14 = vsyncpa [#allocation6], 0 }
   0x2   :  { %15 = vsyncpa [#allocation4], 0  ;;  %s1802_s27 = smov [#allocation5]   ;;  %s1803_s29 = smov [#allocation2]  }
   0x3   :  { %s33_s28 = sshll.u32 %s1802_s27, 4  ;;  %s21_s30 = sshll.u32 %s1803_s29, 4  ;;  %s34_s28 = int_to_ptr.vmem [resolvable:$true] %s33_s28  ;;  %s22_s30 = int_to_ptr.vmem [resolvable:$true] %s21_s30 }
   0x4   :  { %s1724_s9 = scalar_lea.vmem %s34_s28, 1024  ;;  %p1729_p1 = scmp.lt.s32.totalorder %s34_s28, %s34_s28 }
   0x5   :  { %p1725_p0 = scmp.ne.s32.totalorder %s34_s28, %s1724_s9  ;;  %p1730_p2 = scmp.lt.s32.totalorder %s1724_s9, %s1724_s9 }
   0x7   :  { %p1731_p3 = por %p1730_p2, %p1729_p1 }
   0x9   :  { %p1732_p4 = pnand %p1731_p3, %p1725_p0 }
   0xb   :  { %1735 = shalt.err (!%p1732_p4)
}
   0xc   :  { %s1804_s10 = smov 256   ;;  %s1805_s11 = smov 16  }
   0xd   :  { %39 = dma.hbm_to_vmem [thread:$0]  %s2045_s1, 1024, %s34_s28, [#allocation6], %s1804_s10, %s1804_s10, %s1805_s11  }
   0xe   :  { %s1744_s14 = scalar_lea.vmem %s22_s30, 4608  ;;  %p1749_p6 = scmp.lt.s32.totalorder %s22_s30, %s22_s30 }
   0xf   :  { %p1745_p5 = scmp.ne.s32.totalorder %s22_s30, %s1744_s14  ;;  %p1750_p7 = scmp.lt.s32.totalorder %s1744_s14, %s1744_s14 }
  0x11   :  { %p1751_p8 = por %p1750_p7, %p1749_p6 }
  0x13   :  { %p1752_p9 = pnand %p1751_p8, %p1745_p5 }
  0x15   :  { %1755 = shalt.err (!%p1752_p9)
}
  0x16   :  { %27 = dma.hbm_to_vmem [thread:$0]  %s2044_s0, 4608, %s22_s30, [#allocation3], %s1804_s10, %s1804_s10, %s1805_s11  }
  0x17   :  { %s1806_s17 = smov [#allocation7]  }
  0x18   :  { %s55_s18 = sshll.u32 %s1806_s17, 4  ;;  %s56_s18 = int_to_ptr.vmem [resolvable:$true] %s55_s18 }
  0x19   :  { %s1764_s19 = scalar_lea.vmem %s56_s18, 8192  ;;  %p1769_p11 = scmp.lt.s32.totalorder %s56_s18, %s56_s18 }
  0x1a   :  { %p1765_p10 = scmp.ne.s32.totalorder %s56_s18, %s1764_s19  ;;  %p1770_p12 = scmp.lt.s32.totalorder %s1764_s19, %s1764_s19 }
  0x1c   :  { %p1771_p13 = por %p1770_p12, %p1769_p11 }
  0x1e   :  { %p1772_p0 = pnand %p1771_p13, %p1765_p10 }
  0x20   :  { %1775 = shalt.err (!%p1772_p0)
}
  0x21   :  { %s1807_s1 = smov 128   ;;  %s1808_s20 = smov 8  }
  0x22   :  { %61 = dma.hbm_to_vmem [thread:$0]  %s2051_s7, 8192, %s56_s18, [#allocation6], %s1807_s1, %s1807_s1, %s1808_s20  }
  0x23   :  { %1796 = dma.done.wait [#allocation3], 4608  }
  0x24   :  { %1797 = vsyncadd [#allocation3], 4294962688 }
  0x25   :  { %1798 = dma.done.wait [#allocation6], 9216  }
  0x26   :  { %1799 = vsyncadd [#allocation6], 4294958080  ;;  %v1510_v0 = vld [vmem:[#allocation2 + $0xe4] ss:$16 sps:$4 sm:$0xff]   ;;  %v1512_v1 = vld [vmem:[#allocation2 + $0xec] ss:$16 sps:$4 sm:$0xff]  }
  0x27   :  { %303 = vmatprep.subr.bf16.mxu0 %v1510_v0  ;;  %v1514_v2 = vld [vmem:[#allocation2 + $0xe0] ss:$16 sps:$4 sm:$0xff]   ;;  %v1515_v3 = vld [vmem:[#allocation2 + $0xe8] ss:$16 sps:$4 sm:$0xff]   ;;  %346 = vmatprep.subr.bf16.mxu1 %v1512_v1  ;;  %v1516_v4 = vld [vmem:[#allocation2 + $0xc4] ss:$16 sps:$4 sm:$0xff]  }
  0x28   :  { %304 = vmatpush1.bf16.msra.mxu0 %v1514_v2  ;;  %347 = vmatpush1.bf16.msra.mxu1 %v1515_v3  ;;  %v1518_v5 = vld [vmem:[#allocation2 + $0xcc] ss:$16 sps:$4 sm:$0xff]   ;;  %v1520_v6 = vld [vmem:[#allocation2 + $0xc0] ss:$16 sps:$4 sm:$0xff]   ;;  %v1521_v7 = vld [vmem:[#allocation2 + $0xc8] ss:$16 sps:$4 sm:$0xff]  }
  0x29   :  { %305 = vmatprep.subr.bf16.mxu0 %v1516_v4  ;;  %348 = vmatprep.subr.bf16.mxu1 %v1518_v5  ;;  %v1522_v8 = vld [vmem:[#allocation2 + $0xa4] ss:$16 sps:$4 sm:$0xff]   ;;  %v1524_v9 = vld [vmem:[#allocation2 + $0xac] ss:$16 sps:$4 sm:$0xff]   ;;  %v1526_v10 = vld [vmem:[#allocation2 + $0xa0] ss:$16 sps:$4 sm:$0xff]  }
  0x2a   :  { %v1527_v11 = vld [vmem:[#allocation2 + $0xa8] ss:$16 sps:$4 sm:$0xff]   ;;  %v1528_v12 = vld [vmem:[#allocation2 + $0x84] ss:$16 sps:$4 sm:$0xff]   ;;  %v1530_v13 = vld [vmem:[#allocation2 + $0x8c] ss:$16 sps:$4 sm:$0xff]  }
  0x2b   :  { %v1532_v14 = vld [vmem:[#allocation2 + $0x80] ss:$16 sps:$4 sm:$0xff]   ;;  %v1533_v15 = vld [vmem:[#allocation2 + $0x88] ss:$16 sps:$4 sm:$0xff]   ;;  %v1534_v16 = vld [vmem:[#allocation2 + $0x64] ss:$16 sps:$4 sm:$0xff]  }
  0x2c   :  { %306 = vmatpush1.bf16.msra.mxu0 %v1520_v6  ;;  %349 = vmatpush1.bf16.msra.mxu1 %v1521_v7  ;;  %v1536_v17 = vld [vmem:[#allocation2 + $0x6c] ss:$16 sps:$4 sm:$0xff]   ;;  %v1538_v18 = vld [vmem:[#allocation2 + $0x60] ss:$16 sps:$4 sm:$0xff]   ;;  %v1539_v19 = vld [vmem:[#allocation2 + $0x68] ss:$16 sps:$4 sm:$0xff]  }
  0x2d   :  { %307 = vmatprep.subr.bf16.mxu0 %v1522_v8  ;;  %350 = vmatprep.subr.bf16.mxu1 %v1524_v9  ;;  %v1540_v20 = vld [vmem:[#allocation2 + $0x44] ss:$16 sps:$4 sm:$0xff]   ;;  %v1542_v21 = vld [vmem:[#allocation2 + $0x4c] ss:$16 sps:$4 sm:$0xff]   ;;  %v1544_v22 = vld [vmem:[#allocation2 + $0x40] ss:$16 sps:$4 sm:$0xff]  }
  0x2e   :  { %v1545_v23 = vld [vmem:[#allocation2 + $0x48] ss:$16 sps:$4 sm:$0xff]   ;;  %v1546_v24 = vld [vmem:[#allocation2 + $0x24] ss:$16 sps:$4 sm:$0xff]   ;;  %v1548_v25 = vld [vmem:[#allocation2 + $0x2c] ss:$16 sps:$4 sm:$0xff]  }
  0x2f   :  { %v1550_v26 = vld [vmem:[#allocation2 + $0x20] ss:$16 sps:$4 sm:$0xff]   ;;  %v1551_v27 = vld [vmem:[#allocation2 + $0x28] ss:$16 sps:$4 sm:$0xff]   ;;  %v1552_v28 = vld [vmem:[#allocation2 + $0x4] ss:$16 sps:$4 sm:$0xff]  }
  0x30   :  { %308 = vmatpush1.bf16.msra.mxu0 %v1526_v10  ;;  %351 = vmatpush1.bf16.msra.mxu1 %v1527_v11  ;;  %v1554_v29 = vld [vmem:[#allocation2 + $0xc] ss:$16 sps:$4 sm:$0xff]   ;;  %vm299_vm0 = vcmask 130048   ;;  %v1556_v31 = vld [vmem:[#allocation2] ss:$16 sps:$4 sm:$0xff]   ;;  %v1809_v39 = vmov 0  }
  0x31   :  { %309 = vmatprep.subr.bf16.mxu0 %v1528_v12  ;;  %352 = vmatprep.subr.bf16.mxu1 %v1530_v13  ;;  %v1566_v30 = vld [vmem:[%s2046_s2 + $0x4] ss:$8 sps:$4 sm:$0xff]   ;;  %v1557_v32 = vld [vmem:[#allocation2 + $0x8] ss:$16 sps:$4 sm:$0xff]   ;;  %v1562_v35 = vld [vmem:[#allocation2 + $0x100] ss:$16 sps:$4 sm:$0xff]  }
  0x32   :  { %v1558_v33 = vld [vmem:[#allocation2 + $0x104] ss:$16 sps:$4 sm:$0xff]   ;;  %v1560_v34 = vld [vmem:[#allocation2 + $0x10c] ss:$16 sps:$4 sm:$0xff]   ;;  %1395 = vmatprep.mubr.msk.bf16.mxu0 %vm299_vm0, %v1566_v30  ;;  %1396 = vmatprep.mubr.msk.bf16.mxu1 %vm299_vm0, %v1566_v30  ;;  %v1563_v36 = vld [vmem:[#allocation2 + $0x108] ss:$16 sps:$4 sm:$0xff]  }
  0x33   :  { %v1564_v37 = vld [vmem:[%s2046_s2] ss:$8 sps:$4 sm:$0xff]   ;;  %1499 = vset.pattern.permute.xlu1 %v1809_v39  ;;  %1498 = vset.pattern.permute.xlu0 %v1809_v39  ;;  %vm1811_vm1 = vmmov 0   ;;  %vm498_vm2 = vcmask 7168   ;;  %vm523_vm3 = vcmask 15360   ;;  %vm583_vm4 = vcmask 1040384  }
  0x34   :  { %310 = vmatpush1.bf16.msra.mxu0 %v1532_v14  ;;  %353 = vmatpush1.bf16.msra.mxu1 %v1533_v15  ;;  %v442_v38 = vld [vmem:[%s2047_s3 + $0x8] sm:$0xff]  ;;  %v461_v40 = vld [vmem:[%s2048_s4] sm:$0xff] }
  0x35   :  { %311 = vmatprep.subr.bf16.mxu0 %v1534_v16  ;;  %354 = vmatprep.subr.bf16.mxu1 %v1536_v17  ;;  %v441_v55 = vld [vmem:[%s2047_s3] sm:$0xff] }
  0x36   :  { %450 = vperm.xlu1 %1499, %v442_v38  }
  0x38   :  { %312 = vmatpush1.bf16.msra.mxu0 %v1538_v18  ;;  %355 = vmatpush1.bf16.msra.mxu1 %v1539_v19  ;;  %v462_v18 = vld [vmem:[%s2048_s4 + $0x8] sm:$0xff]  ;;  %s1812_s4 = smov 2  }
  0x39   :  { %313 = vmatprep.subr.bf16.mxu0 %v1540_v20  ;;  %356 = vmatprep.subr.bf16.mxu1 %v1542_v21 }
  0x3a   :  { %465 = vperm.xlu1 %1499, %v461_v40  }
  0x3c   :  { %314 = vmatpush1.bf16.msra.mxu0 %v1544_v22  ;;  %357 = vmatpush1.bf16.msra.mxu1 %v1545_v23 }
  0x3d   :  { %315 = vmatprep.subr.bf16.mxu0 %v1546_v24  ;;  %358 = vmatprep.subr.bf16.mxu1 %v1548_v25 }
  0x40   :  { %316 = vmatpush1.bf16.msra.mxu0 %v1550_v26  ;;  %359 = vmatpush1.bf16.msra.mxu1 %v1551_v27 }
  0x41   :  { %317 = vmatprep.subr.bf16.mxu0 %v1552_v28  ;;  %360 = vmatprep.subr.bf16.mxu1 %v1554_v29 }
  0x44   :  { %318 = vmatpush1.bf16.msra.mxu0 %v1556_v31  ;;  %361 = vmatpush1.bf16.msra.mxu1 %v1557_v32 }
  0x45   :  { %333 = vmatprep.subr.bf16.mxu0 %v1558_v33  ;;  %376 = vmatprep.subr.bf16.mxu1 %v1560_v34 }
  0x48   :  { %334 = vmatpush2.bf16.msra.mxu0 %v1562_v35  ;;  %377 = vmatpush2.bf16.msra.mxu1 %v1563_v36 }
  0x4b   :  { %336 = vmatmul.mubr.bf16.vlgmr.msra.gmra.mxu0 %v1564_v37  ;;  %379 = vmatmul.mubr.bf16.vlgmr.msra.gmra.mxu1 %v1564_v37 }
  0xb1   :  { %v451_v19 = vpop.permute.xlu1 %450 }
  0xb5   :  { %v466_v20 = vpop.permute.xlu1 %465 }
 0x10b   :  { %v337_v41 = vpop.f32.mrf.mxu0  ;;  %v380_v42 = vpop.f32.mrf.mxu1 }
 0x10d   :  { %v339_v43 = vpop.f32.mrf.mxu0  ;;  %v382_v44 = vpop.f32.mrf.mxu1 }
 0x10e   :  { %v389_v45 = vadd.f32 %v339_v43, %v337_v41 }
 0x10f   :  { %v341_v46 = vpop.f32.mrf.mxu0  ;;  %v384_v48 = vpop.f32.mrf.mxu1 }
 0x110   :  { %v390_v47 = vadd.f32 %v389_v45, %v380_v42 }
 0x111   :  { %v343_v49 = vpop.f32.mrf.mxu0  ;;  %v386_v53 = vpop.f32.mrf.mxu1 }
 0x112   :  { %v394_v50 = vadd.f32 %v343_v49, %v341_v46  ;;  %v391_v51 = vadd.f32 %v390_v47, %v382_v44 }
 0x114   :  { %392 = vadd.xlane.f32.xlu0 %v391_v51  ;;  %v395_v52 = vadd.f32 %v394_v50, %v384_v48 }
 0x116   :  { %v396_v54 = vadd.f32 %v395_v52, %v386_v53 }
 0x118   :  { %397 = vadd.xlane.f32.xlu0 %v396_v54 }
 0x12e   :  { %445 = vperm.xlu0 %1498, %v441_v55  }
 0x19d   :  { %v393_v56 = vpop.xlane.xlu0 %392 }
 0x19e   :  { %v399_v57 = vmul.f32 0.001953125, %v393_v56 }
 0x1a0   :  { %v401_v58 = vsub.f32 %v337_v41, %v399_v57  ;;  %v402_v59 = vsub.f32 %v339_v43, %v399_v57  ;;  %v403_v60 = vsub.f32 %v380_v42, %v399_v57  ;;  %v404_v62 = vsub.f32 %v382_v44, %v399_v57 }
 0x1a1   :  { %v398_v61 = vpop.xlane.xlu0 %397 }
 0x1a2   :  { %v400_v63 = vmul.f32 0.001953125, %v398_v61  ;;  %v409_v0 = vmul.f32 %v401_v58, %v401_v58  ;;  %v410_v1 = vmul.f32 %v402_v59, %v402_v59  ;;  %v411_v2 = vmul.f32 %v403_v60, %v403_v60 }
 0x1a3   :  { %v412_v7 = vmul.f32 %v404_v62, %v404_v62 }
 0x1a4   :  { %v405_v3 = vsub.f32 %v341_v46, %v400_v63  ;;  %v406_v4 = vsub.f32 %v343_v49, %v400_v63  ;;  %v417_v5 = vadd.f32 %v410_v1, %v409_v0  ;;  %v407_v6 = vsub.f32 %v384_v48, %v400_v63 }
 0x1a5   :  { %v408_v9 = vsub.f32 %v386_v53, %v400_v63  ;;  %v1810_v1 = vmov 0.0  }
 0x1a6   :  { %v418_v8 = vadd.f32 %v417_v5, %v411_v2  ;;  %v413_v10 = vmul.f32 %v405_v3, %v405_v3  ;;  %v414_v11 = vmul.f32 %v406_v4, %v406_v4  ;;  %v415_v13 = vmul.f32 %v407_v6, %v407_v6  ;;  %1472 = vmatprep.subr.bf16.mxu0 %v1810_v1 }
 0x1a7   :  { %v416_v15 = vmul.f32 %v408_v9, %v408_v9  ;;  %1478 = vmatprep.subr.bf16.mxu1 %v1810_v1  ;;  %1474 = vmatprep.mubr.msk.bf16.mxu0 %vm1811_vm1, %v1810_v1 }
 0x1a8   :  { %v419_v12 = vadd.f32 %v418_v8, %v412_v7  ;;  %v422_v14 = vadd.f32 %v414_v11, %v413_v10  ;;  %1480 = vmatprep.mubr.msk.bf16.mxu1 %vm1811_vm1, %v1810_v1  ;;  %v1592_v1 = vld [vmem:[#allocation7 + $0x130] ss:$8 sps:$4 sm:$0xff]  }
 0x1a9   :  { %v446_v28 = vpop.permute.xlu0 %445 }
 0x1aa   :  { %420 = vadd.xlane.f32.xlu1 %v419_v12  ;;  %v423_v16 = vadd.f32 %v422_v14, %v415_v13 }
 0x1ac   :  { %v424_v17 = vadd.f32 %v423_v16, %v416_v15 }
 0x1ae   :  { %425 = vadd.xlane.f32.xlu1 %v424_v17 }
 0x1bf   :  { %470 = vperm.xlu1 %1499, %v462_v18  }
 0x233   :  { %v421_v21 = vpop.xlane.xlu1 %420 }
 0x234   :  { %v427_v22 = vmul.f32 0.001953125, %v421_v21 }
 0x236   :  { %v429_v23 = vadd.f32 1e-05, %v427_v22 }
 0x237   :  { %v426_v24 = vpop.xlane.xlu1 %425 }
 0x238   :  { %1664 = vrsqrt.f32 %v429_v23  ;;  %v428_v25 = vmul.f32 0.001953125, %v426_v24  ;;  %v526_v24 = vld [vmem:[%s2049_s5] sm:$0x1]  ;;  %s1813_s5 = smov 126  }
 0x23a   :  { %v430_v26 = vadd.f32 1e-05, %v428_v25 }
 0x23b   :  { %v471_v50 = vpop.permute.xlu1 %470 }
 0x23c   :  { %1666 = vrsqrt.f32 %v430_v26 }
 0x245   :  { %v1665_v27 = vpop.eup %1664 }
 0x246   :  { %v433_v29 = vmul.f32 %v1665_v27, %v401_v58  ;;  %v434_v30 = vmul.f32 %v1665_v27, %v402_v59  ;;  %v435_v31 = vmul.f32 %v1665_v27, %v403_v60  ;;  %v436_v32 = vmul.f32 %v1665_v27, %v404_v62 }
 0x248   :  { %v453_v33 = vmul.f32 %v446_v28, %v433_v29  ;;  %v454_v34 = vmul.f32 %v446_v28, %v434_v30  ;;  %v455_v35 = vmul.f32 %v446_v28, %v435_v31  ;;  %v456_v37 = vmul.f32 %v446_v28, %v436_v32  ;;  %v1567_v31 = vld [vmem:[%s2050_s6] sm:$0xff]   ;;  %s1815_s6 = smov [#allocation8]  }
 0x249   :  { %v1667_v36 = vpop.eup %1666  ;;  %s1344_s15 = sshll.u32 %s1815_s6, 4  ;;  %s1345_s15 = int_to_ptr.vmem [resolvable:$true] %s1344_s15 }
 0x24a   :  { %v437_v38 = vmul.f32 %v1667_v36, %v405_v3  ;;  %v438_v40 = vmul.f32 %v1667_v36, %v406_v4  ;;  %v439_v41 = vmul.f32 %v1667_v36, %v407_v6  ;;  %v440_v42 = vmul.f32 %v1667_v36, %v408_v9  ;;  %s1776_s16 = scalar_lea.vmem %s1345_s15, 1024  ;;  %p1781_p2 = scmp.lt.s32.totalorder %s1345_s15, %s1345_s15 }
 0x24b   :  { %v1898_v43 = vadd.f32 %v466_v20, %v453_v33  ;;  %v1900_v44 = vadd.f32 %v466_v20, %v454_v34  ;;  %v1902_v47 = vadd.f32 %v466_v20, %v455_v35  ;;  %v1906_v52 = vadd.f32 %v466_v20, %v456_v37  ;;  %p1777_p1 = scmp.ne.s32.totalorder %s1345_s15, %s1776_s16  ;;  %p1782_p3 = scmp.lt.s32.totalorder %s1776_s16, %s1776_s16 }
 0x24c   :  { %v457_v45 = vmul.f32 %v451_v19, %v437_v38  ;;  %v458_v46 = vmul.f32 %v451_v19, %v438_v40  ;;  %v459_v48 = vmul.f32 %v451_v19, %v439_v41  ;;  %v460_v49 = vmul.f32 %v451_v19, %v440_v42  ;;  %v1568_v38 = vld [vmem:[#allocation7 + $0x170] ss:$8 sps:$4 sm:$0xff]   ;;  %v1570_v40 = vld [vmem:[#allocation7 + $0x174] ss:$8 sps:$4 sm:$0xff]  }
 0x24d   :  { %v501_v51 = vmax.f32 %v1898_v43, %v1900_v44  ;;  %v507_v58 = vmax.f32 %v1902_v47, %v1906_v52  ;;  %v490_v59 = vadd.f32 %v1906_v52, %v1902_v47  ;;  %v481_v61 = vadd.f32 %v1900_v44, %v1898_v43  ;;  %v1571_v41 = vld [vmem:[#allocation7 + $0x70] ss:$8 sps:$4 sm:$0xff]   ;;  %v1573_v42 = vld [vmem:[#allocation7 + $0x74] ss:$8 sps:$4 sm:$0xff]   ;;  %p1783_p4 = por %p1782_p3, %p1781_p2 }
 0x24e   :  { %v1908_v53 = vadd.f32 %v471_v50, %v457_v45  ;;  %v1910_v54 = vadd.f32 %v471_v50, %v458_v46  ;;  %v1914_v56 = vadd.f32 %v471_v50, %v459_v48  ;;  %v1916_v57 = vadd.f32 %v471_v50, %v460_v49  ;;  %v1576_v45 = vld [vmem:[#allocation7 + $0x164] ss:$8 sps:$4 sm:$0xff]   ;;  %v1574_v48 = vld [vmem:[#allocation7 + $0x160] ss:$8 sps:$4 sm:$0xff]   ;;  %v1582_v50 = vld [vmem:[#allocation7 + $0x154] ss:$8 sps:$4 sm:$0xff]  }
 0x24f   :  { %502 = vmax.xlane.f32.xlu1 %v501_v51  ;;  %v1814_v37 = vmov 1   ;;  %v1579_v46 = vld [vmem:[#allocation7 + $0x64] ss:$8 sps:$4 sm:$0xff]   ;;  %v1577_v49 = vld [vmem:[#allocation7 + $0x60] ss:$8 sps:$4 sm:$0xff]   ;;  %p1784_p5 = pnand %p1783_p4, %p1777_p1 }
 0x250   :  { %v504_v55 = vmax.f32 %v1908_v53, %v1910_v54  ;;  %v510_v60 = vmax.f32 %v1914_v56, %v1916_v57  ;;  %v484_v62 = vadd.f32 %v1910_v54, %v1908_v53  ;;  %v493_v63 = vadd.f32 %v1916_v57, %v1914_v56  ;;  %1505 = vset.pattern.permute.xlu0 %v1814_v37  ;;  %v1585_v51 = vld [vmem:[#allocation7 + $0x54] ss:$8 sps:$4 sm:$0xff]  }
 0x251   :  { %1506 = vset.pattern.permute.xlu1 %v1814_v37 }
 0x252   :  { %505 = vmax.xlane.f32.xlu0 %v504_v55  ;;  %v1580_v55 = vld [vmem:[#allocation7 + $0x150] ss:$8 sps:$4 sm:$0xff]  }
 0x253   :  { %508 = vmax.xlane.f32.xlu1 %v507_v58  ;;  %v1583_v58 = vld [vmem:[#allocation7 + $0x50] ss:$8 sps:$4 sm:$0xff]  }
 0x256   :  { %491 = vadd.xlane.f32.xlu0 %v490_v59  ;;  %v1588_v59 = vld [vmem:[#allocation7 + $0x144] ss:$8 sps:$4 sm:$0xff]  }
 0x257   :  { %511 = vmax.xlane.f32.xlu1 %v510_v60  ;;  %v1591_v60 = vld [vmem:[#allocation7 + $0x44] ss:$8 sps:$4 sm:$0xff]  }
 0x25b   :  { %482 = vadd.xlane.f32.xlu1 %v481_v61  ;;  %v1586_v61 = vld [vmem:[#allocation7 + $0x140] ss:$8 sps:$4 sm:$0xff]  }
 0x25f   :  { %485 = vadd.xlane.f32.xlu1 %v484_v62  ;;  %v1589_v62 = vld [vmem:[#allocation7 + $0x40] ss:$8 sps:$4 sm:$0xff]  }
 0x263   :  { %494 = vadd.xlane.f32.xlu1 %v493_v63  ;;  %v1594_v63 = vld [vmem:[#allocation7 + $0x134] ss:$8 sps:$4 sm:$0xff]  }
 0x2d8   :  { %v503_v0 = vpop.xlane.xlu1 %502 }
 0x2db   :  { %v506_v3 = vpop.xlane.xlu0 %505 }
 0x2dc   :  { %v509_v2 = vpop.xlane.xlu1 %508 }
 0x2dd   :  { %v513_v5 = vsel %vm498_vm2, %v503_v0, %v509_v2  ;;  %v1597_v0 = vld [vmem:[#allocation7 + $0x34] ss:$8 sps:$4 sm:$0xff]   ;;  %v1595_v2 = vld [vmem:[#allocation7 + $0x30] ss:$8 sps:$4 sm:$0xff]  }
 0x2df   :  { %v492_v11 = vpop.xlane.xlu0 %491 }
 0x2e0   :  { %v512_v4 = vpop.xlane.xlu1 %511  ;;  %v496_v14 = vmul.f32 0.00390625, %v492_v11  ;;  %v1612_v11 = vld [vmem:[#allocation7 + $0x104] ss:$8 sps:$4 sm:$0xff]  }
 0x2e1   :  { %v514_v6 = vsel %vm498_vm2, %v506_v3, %v512_v4  ;;  %v1600_v3 = vld [vmem:[#allocation7 + $0x124] ss:$8 sps:$4 sm:$0xff]  }
 0x2e2   :  { %v1500_v7 = vpack.i.bf16 %v514_v6, %v513_v5  ;;  %v1603_v4 = vld [vmem:[#allocation7 + $0x24] ss:$8 sps:$4 sm:$0xff]   ;;  %v1598_v5 = vld [vmem:[#allocation7 + $0x120] ss:$8 sps:$4 sm:$0xff]  }
 0x2e3   :  { %v1601_v6 = vld [vmem:[#allocation7 + $0x20] ss:$8 sps:$4 sm:$0xff]  }
 0x2e4   :  { %1501 = vrot.lane.b32.xlu0 %v1500_v7, %s1812_s4  ;;  %v483_v8 = vpop.xlane.xlu1 %482  ;;  %v1606_v7 = vld [vmem:[#allocation7 + $0x114] ss:$8 sps:$4 sm:$0xff]  }
 0x2e5   :  { %v488_v12 = vmul.f32 0.00390625, %v483_v8  ;;  %v1609_v8 = vld [vmem:[#allocation7 + $0x14] ss:$8 sps:$4 sm:$0xff]  }
 0x2e7   :  { %v499_v19 = vsel %vm498_vm2, %v488_v12, %v496_v14  ;;  %v1615_v12 = vld [vmem:[#allocation7 + $0x4] ss:$8 sps:$4 sm:$0xff]   ;;  %v1613_v14 = vld [vmem:[#allocation7] ss:$8 sps:$4 sm:$0xff]  }
 0x2e8   :  { %v486_v9 = vpop.xlane.xlu1 %485 }
 0x2e9   :  { %v489_v15 = vmul.f32 0.00390625, %v486_v9  ;;  %v1604_v9 = vld [vmem:[#allocation7 + $0x110] ss:$8 sps:$4 sm:$0xff]  }
 0x2ec   :  { %v495_v10 = vpop.xlane.xlu1 %494 }
 0x2ed   :  { %v497_v13 = vmul.f32 0.00390625, %v495_v10  ;;  %v1607_v10 = vld [vmem:[#allocation7 + $0x10] ss:$8 sps:$4 sm:$0xff]  }
 0x2ef   :  { %v500_v20 = vsel %vm498_vm2, %v489_v15, %v497_v13  ;;  %v1610_v13 = vld [vmem:[#allocation7 + $0x100] ss:$8 sps:$4 sm:$0xff]   ;;  %v1618_v15 = vld [vmem:[#allocation7 + $0x1f4] ss:$8 sps:$4 sm:$0xff]  }
 0x356   :  { %v1502_v16 = vpop.permute.xlu0 %1501 }
 0x357   :  { %v1504_v17 = vunpack.i.h.bf16 %v1502_v16  ;;  %v1503_v18 = vunpack.i.l.bf16 %v1502_v16  ;;  %v1621_v16 = vld [vmem:[#allocation7 + $0xf4] ss:$8 sps:$4 sm:$0xff]  }
 0x359   :  { %v525_v21 = vsel %vm523_vm3, %v500_v20, %v1504_v17  ;;  %v524_v22 = vsel %vm523_vm3, %v499_v19, %v1503_v18  ;;  %v1616_v17 = vld [vmem:[#allocation7 + $0x1f0] ss:$8 sps:$4 sm:$0xff]  }
 0x35a   :  { %v527_v23 = vpack.c.bf16 %v525_v21, %v524_v22  ;;  %v1619_v18 = vld [vmem:[#allocation7 + $0xf0] ss:$8 sps:$4 sm:$0xff]  }
 0x35c   :  { %1473 = vmatpush3.bf16.msra.mxu0 %v527_v23 }
 0x35d   :  { %1145 = vmatprep.subr.bf16.mxu0 %v1573_v42 }
 0x35f   :  { %1475 = vmatmul.mubr.msk.bf16.vlgmr.msra.gmra.mxu0 %vm299_vm0, %v526_v24 }
 0x360   :  { %1146 = vmatpush1.bf16.msra.mxu0 %v1571_v41  ;;  %v1627_v41 = vld [vmem:[#allocation7 + $0xe4] ss:$8 sps:$4 sm:$0xff]  }
 0x361   :  { %1147 = vmatprep.subr.bf16.mxu0 %v1579_v46 }
 0x364   :  { %1148 = vmatpush1.bf16.msra.mxu0 %v1577_v49  ;;  %v1633_v49 = vld [vmem:[#allocation7 + $0xd4] ss:$8 sps:$4 sm:$0xff]  }
 0x365   :  { %1149 = vmatprep.subr.bf16.mxu0 %v1585_v51  ;;  %v1631_v51 = vld [vmem:[#allocation7 + $0xd0] ss:$8 sps:$4 sm:$0xff]  }
 0x368   :  { %1150 = vmatpush1.bf16.msra.mxu0 %v1583_v58  ;;  %v1634_v58 = vld [vmem:[#allocation7 + $0x1c0] ss:$8 sps:$4 sm:$0xff]  }
 0x369   :  { %1151 = vmatprep.subr.bf16.mxu0 %v1591_v60  ;;  %v1637_v60 = vld [vmem:[#allocation7 + $0xc0] ss:$8 sps:$4 sm:$0xff]  }
 0x36c   :  { %1152 = vmatpush1.bf16.msra.mxu0 %v1589_v62  ;;  %v1640_v62 = vld [vmem:[#allocation7 + $0x1b0] ss:$8 sps:$4 sm:$0xff]  }
 0x36d   :  { %1153 = vmatprep.subr.bf16.mxu0 %v1597_v0  ;;  %v1643_v0 = vld [vmem:[#allocation7 + $0xb0] ss:$8 sps:$4 sm:$0xff]  }
 0x370   :  { %1154 = vmatpush1.bf16.msra.mxu0 %v1595_v2  ;;  %v1646_v2 = vld [vmem:[#allocation7 + $0x1a0] ss:$8 sps:$4 sm:$0xff]  }
 0x371   :  { %1155 = vmatprep.subr.bf16.mxu0 %v1603_v4  ;;  %v1649_v4 = vld [vmem:[#allocation7 + $0xa0] ss:$8 sps:$4 sm:$0xff]  }
 0x374   :  { %1156 = vmatpush1.bf16.msra.mxu0 %v1601_v6  ;;  %v1657_v6 = vld [vmem:[#allocation7 + $0x94] ss:$8 sps:$4 sm:$0xff]  }
 0x375   :  { %1157 = vmatprep.subr.bf16.mxu0 %v1609_v8  ;;  %v1660_v8 = vld [vmem:[#allocation7 + $0x184] ss:$8 sps:$4 sm:$0xff]  }
 0x378   :  { %1158 = vmatpush1.bf16.msra.mxu0 %v1607_v10  ;;  %v1663_v10 = vld [vmem:[#allocation7 + $0x84] ss:$8 sps:$4 sm:$0xff]  }
 0x379   :  { %1159 = vmatprep.subr.bf16.mxu0 %v1615_v12 }
 0x37c   :  { %1160 = vmatpush1.bf16.msra.mxu0 %v1613_v14 }
 0x37d   :  { %1161 = vmatprep.subr.bf16.mxu0 %v1621_v16 }
 0x380   :  { %1162 = vmatpush2.bf16.msra.mxu0 %v1619_v18 }
 0x381   :  { %1163 = vmatprep.subr.bf16.mxu0 %v1627_v41 }
 0x41f   :  { %v565_v25 = vpop.f32.mrf.mxu0 }
 0x420   :  { %v571_v26 = vmax.f32 %v565_v25, 0.0 }
 0x421   :  { %v1476_v27 = vpop.f32.mrf.mxu0 }
 0x422   :  { %v574_v28 = vpack.c.bf16 %v571_v26, %v571_v26 }
 0x423   :  { %v568_v29 = vpop.f32.mrf.mxu0 }
 0x424   :  { %v585_v30 = vsel %vm583_vm4, %v574_v28, 0 }
 0x425   :  { %v1477_v32 = vpop.f32.mrf.mxu0  ;;  %1479 = vmatpush3.bf16.msra.mxu1 %v585_v30 }
 0x426   :  { %1186 = vmatprep.subr.bf16.mxu1 %v1570_v40 }
 0x428   :  { %1481 = vmatmul.mubr.msk.bf16.vlgmr.msra.gmra.mxu1 %vm523_vm3, %v1567_v31 }
 0x429   :  { %1187 = vmatpush1.bf16.msra.mxu1 %v1568_v38  ;;  %v1625_v38 = vld [vmem:[#allocation7 + $0xe0] ss:$8 sps:$4 sm:$0xff]  }
 0x42a   :  { %1188 = vmatprep.subr.bf16.mxu1 %v1576_v45  ;;  %v1630_v45 = vld [vmem:[#allocation7 + $0x1d4] ss:$8 sps:$4 sm:$0xff]   ;;  %1164 = vmatpush2.bf16.msra.mxu0 %v1625_v38 }
 0x42b   :  { %1165 = vmatprep.subr.bf16.mxu0 %v1633_v49 }
 0x42d   :  { %1189 = vmatpush1.bf16.msra.mxu1 %v1574_v48  ;;  %v1628_v48 = vld [vmem:[#allocation7 + $0x1d0] ss:$8 sps:$4 sm:$0xff]  }
 0x42e   :  { %1190 = vmatprep.subr.bf16.mxu1 %v1582_v50  ;;  %1166 = vmatpush2.bf16.msra.mxu0 %v1631_v51 }
 0x431   :  { %1191 = vmatpush1.bf16.msra.mxu1 %v1580_v55  ;;  %v1636_v55 = vld [vmem:[#allocation7 + $0x1c4] ss:$8 sps:$4 sm:$0xff]  }
 0x432   :  { %1192 = vmatprep.subr.bf16.mxu1 %v1588_v59  ;;  %v1639_v59 = vld [vmem:[#allocation7 + $0xc4] ss:$8 sps:$4 sm:$0xff]  }
 0x433   :  { %1167 = vmatprep.subr.bf16.mxu0 %v1639_v59 }
 0x434   :  { %1168 = vmatpush2.bf16.msra.mxu0 %v1637_v60 }
 0x435   :  { %1193 = vmatpush1.bf16.msra.mxu1 %v1586_v61  ;;  %v1642_v61 = vld [vmem:[#allocation7 + $0x1b4] ss:$8 sps:$4 sm:$0xff]  }
 0x436   :  { %1194 = vmatprep.subr.bf16.mxu1 %v1594_v63  ;;  %v1645_v63 = vld [vmem:[#allocation7 + $0xb4] ss:$8 sps:$4 sm:$0xff]  }
 0x437   :  { %1169 = vmatprep.subr.bf16.mxu0 %v1645_v63 }
 0x438   :  { %1170 = vmatpush2.bf16.msra.mxu0 %v1643_v0 }
 0x439   :  { %1195 = vmatpush1.bf16.msra.mxu1 %v1592_v1  ;;  %v1648_v1 = vld [vmem:[#allocation7 + $0x1a4] ss:$8 sps:$4 sm:$0xff]  }
 0x43a   :  { %1196 = vmatprep.subr.bf16.mxu1 %v1600_v3  ;;  %v1651_v3 = vld [vmem:[#allocation7 + $0xa4] ss:$8 sps:$4 sm:$0xff]  }
 0x43b   :  { %1171 = vmatprep.subr.bf16.mxu0 %v1651_v3 }
 0x43c   :  { %1172 = vmatpush2.bf16.msra.mxu0 %v1649_v4 }
 0x43d   :  { %1197 = vmatpush1.bf16.msra.mxu1 %v1598_v5  ;;  %v1654_v5 = vld [vmem:[#allocation7 + $0x194] ss:$8 sps:$4 sm:$0xff]   ;;  %1173 = vmatprep.subr.bf16.mxu0 %v1657_v6 }
 0x43e   :  { %1198 = vmatprep.subr.bf16.mxu1 %v1606_v7  ;;  %v1655_v7 = vld [vmem:[#allocation7 + $0x90] ss:$8 sps:$4 sm:$0xff]  }
 0x440   :  { %1174 = vmatpush2.bf16.msra.mxu0 %v1655_v7 }
 0x441   :  { %1199 = vmatpush1.bf16.msra.mxu1 %v1604_v9  ;;  %v1661_v9 = vld [vmem:[#allocation7 + $0x80] ss:$8 sps:$4 sm:$0xff]   ;;  %1175 = vmatprep.subr.bf16.mxu0 %v1663_v10 }
 0x442   :  { %1200 = vmatprep.subr.bf16.mxu1 %v1612_v11 }
 0x444   :  { %1176 = vmatpush2.bf16.msra.mxu0 %v1661_v9 }
 0x445   :  { %1201 = vmatpush1.bf16.msra.mxu1 %v1610_v13 }
 0x446   :  { %1202 = vmatprep.subr.bf16.mxu1 %v1618_v15 }
 0x449   :  { %1203 = vmatpush2.bf16.msra.mxu1 %v1616_v17 }
 0x4e8   :  { %v1945_v33 = vpop.f32.mrf.mxu1 }
 0x4e9   :  { %630 = vrot.lane.b32.xlu1 %v1945_v33, %s1813_s5 }
 0x4ea   :  { %v1482_v34 = vpop.f32.mrf.mxu1 }
 0x4eb   :  { %v1624_v34 = vld [vmem:[#allocation7 + $0x1e4] ss:$8 sps:$4 sm:$0xff]  }
 0x4ec   :  { %v1948_v35 = vpop.f32.mrf.mxu1  ;;  %1204 = vmatprep.subr.bf16.mxu1 %v1624_v34 }
 0x4ed   :  { %632 = vrot.lane.b32.xlu1 %v1948_v35, %s1813_s5 }
 0x4ee   :  { %v1483_v36 = vpop.f32.mrf.mxu1 }
 0x55b   :  { %v631_v19 = vpop.permute.xlu1 %630 }
 0x55c   :  { %v636_v20 = vadd.f32 %v631_v19, %v1945_v33  ;;  %v1622_v33 = vld [vmem:[#allocation7 + $0x1e0] ss:$8 sps:$4 sm:$0xff]  }
 0x55d   :  { %1205 = vmatpush2.bf16.msra.mxu1 %v1622_v33 }
 0x55e   :  { %v638_v21 = vsub.f32 0.0, %v636_v20  ;;  %1206 = vmatprep.subr.bf16.mxu1 %v1630_v45 }
 0x55f   :  { %v633_v22 = vpop.permute.xlu1 %632 }
 0x560   :  { %v640_v23 = vmul.f32 1.442695, %v638_v21  ;;  %v637_v24 = vadd.f32 %v633_v22, %v1948_v35 }
 0x561   :  { %1207 = vmatpush2.bf16.msra.mxu1 %v1628_v48 }
 0x562   :  { %1668 = vpow2.f32 %v640_v23  ;;  %v639_v25 = vsub.f32 0.0, %v637_v24  ;;  %1208 = vmatprep.subr.bf16.mxu1 %v1636_v55 }
 0x564   :  { %v642_v26 = vmul.f32 1.442695, %v639_v25 }
 0x565   :  { %1209 = vmatpush2.bf16.msra.mxu1 %v1634_v58 }
 0x566   :  { %1670 = vpow2.f32 %v642_v26  ;;  %1210 = vmatprep.subr.bf16.mxu1 %v1642_v61 }
 0x569   :  { %1211 = vmatpush2.bf16.msra.mxu1 %v1640_v62 }
 0x56a   :  { %1212 = vmatprep.subr.bf16.mxu1 %v1648_v1 }
 0x56d   :  { %1213 = vmatpush2.bf16.msra.mxu1 %v1646_v2 }
 0x56e   :  { %1214 = vmatprep.subr.bf16.mxu1 %v1654_v5 }
 0x56f   :  { %v1669_v27 = vpop.eup %1668 }
 0x570   :  { %v644_v28 = vadd.f32 1.0, %v1669_v27 }
 0x572   :  { %1672 = vrcp.f32 %v644_v28 }
 0x573   :  { %v1671_v29 = vpop.eup %1670 }
 0x574   :  { %v645_v30 = vadd.f32 1.0, %v1671_v29 }
 0x576   :  { %1674 = vrcp.f32 %v645_v30 }
 0x57f   :  { %v1673_v31 = vpop.eup %1672 }
 0x580   :  { %v1400_v32 = vadd.f32 -1.0, %v1673_v31 }
 0x582   :  { %v650_v36 = vmul.f32 0.042, %v1400_v32 }
 0x583   :  { %v1675_v40 = vpop.eup %1674 }
 0x584   :  { %v652_v35 = vadd.f32 1.0, %v650_v36  ;;  %v1401_v42 = vadd.f32 -1.0, %v1675_v40 }
 0x586   :  { %700 = vperm.xlu0 %1505, %v652_v35   ;;  %v651_v46 = vmul.f32 0.042, %v1401_v42 }
 0x588   :  { %v653_v50 = vadd.f32 1.0, %v651_v46 }
 0x58a   :  { %1508 = vset.pattern.permute.xlu0 %v1809_v39  ;;  %704 = vperm.xlu1 %1506, %v653_v50  }
 0x58b   :  { %661 = vperm.xlu0 %1508, %v653_v50  }
 0x58e   :  { %1507 = vset.pattern.permute.xlu1 %v1809_v39  ;;  %v1652_v39 = vld [vmem:[#allocation7 + $0x190] ss:$8 sps:$4 sm:$0xff]  }
 0x58f   :  { %656 = vperm.xlu1 %1507, %v652_v35   ;;  %1509 = vset.pattern.permute.xlu0 %v1814_v37  ;;  %v1658_v37 = vld [vmem:[#allocation7 + $0x180] ss:$8 sps:$4 sm:$0xff]  }
 0x590   :  { %1215 = vmatpush2.bf16.msra.mxu1 %v1652_v39 }
 0x591   :  { %1216 = vmatprep.subr.bf16.mxu1 %v1660_v8 }
 0x594   :  { %1217 = vmatpush2.bf16.msra.mxu1 %v1658_v37 }
 0x601   :  { %v701_v11 = vpop.permute.xlu0 %700 }
 0x602   :  { %v1959_v13 = vmul.f32 %v701_v11, %v1902_v47  ;;  %v1962_v14 = vmul.f32 %v701_v11, %v1906_v52 }
 0x605   :  { %v705_v12 = vpop.permute.xlu1 %704 }
 0x606   :  { %v1965_v15 = vmul.f32 %v705_v12, %v1914_v56  ;;  %v1968_v16 = vmul.f32 %v705_v12, %v1916_v57  ;;  %v662_v52 = vpop.permute.xlu0 %661 }
 0x607   :  { %v1979_v57 = vmul.f32 %v662_v52, %v1908_v53  ;;  %v1982_v24 = vmul.f32 %v662_v52, %v1910_v54 }
 0x608   :  { %v711_v17 = vadd.f32 %v1965_v15, %v1959_v13  ;;  %v718_v18 = vadd.f32 %v1968_v16, %v1962_v14  ;;  %v727_v19 = vmax.f32 %v1959_v13, %v1965_v15  ;;  %v734_v47 = vmax.f32 %v1962_v14, %v1968_v16 }
 0x60a   :  { %v712_v20 = vrot.slane %v711_v17, 4  ;;  %v719_v21 = vrot.slane %v718_v18, 4  ;;  %v728_v56 = vrot.slane %v727_v19, 4  ;;  %v735_v22 = vrot.slane %v734_v47, 4  ;;  %v657_v23 = vpop.permute.xlu1 %656 }
 0x60b   :  { %v1985_v25 = vmul.f32 %v657_v23, %v1898_v43  ;;  %v1988_v26 = vmul.f32 %v657_v23, %v1900_v44 }
 0x60c   :  { %v713_v27 = vadd.f32 %v712_v20, %v711_v17  ;;  %v720_v28 = vadd.f32 %v719_v21, %v718_v18  ;;  %v729_v29 = vmax.f32 %v727_v19, %v728_v56  ;;  %v736_v30 = vmax.f32 %v734_v47, %v735_v22 }
 0x60d   :  { %v668_v31 = vadd.f32 %v1979_v57, %v1985_v25  ;;  %v675_v53 = vadd.f32 %v1982_v24, %v1988_v26  ;;  %v685_v54 = vmax.f32 %v1985_v25, %v1979_v57  ;;  %v692_v43 = vmax.f32 %v1988_v26, %v1982_v24 }
 0x60e   :  { %v714_v32 = vrot.slane %v713_v27, 2  ;;  %v721_v34 = vrot.slane %v720_v28, 2  ;;  %v730_v44 = vrot.slane %v729_v29, 2  ;;  %v737_v36 = vrot.slane %v736_v30, 2 }
 0x60f   :  { %v669_v33 = vrot.slane %v668_v31, 4  ;;  %v676_v38 = vrot.slane %v675_v53, 4  ;;  %v686_v40 = vrot.slane %v685_v54, 4  ;;  %v693_v41 = vrot.slane %v692_v43, 4 }
 0x610   :  { %v715_v35 = vadd.f32 %v714_v32, %v713_v27  ;;  %v722_v42 = vadd.f32 %v721_v34, %v720_v28  ;;  %v731_v45 = vmax.f32 %v729_v29, %v730_v44  ;;  %v738_v46 = vmax.f32 %v736_v30, %v737_v36 }
 0x611   :  { %v670_v48 = vadd.f32 %v669_v33, %v668_v31  ;;  %v677_v49 = vadd.f32 %v676_v38, %v675_v53  ;;  %v687_v50 = vmax.f32 %v685_v54, %v686_v40  ;;  %v694_v51 = vmax.f32 %v692_v43, %v693_v41 }
 0x612   :  { %v716_v55 = vrot.slane %v715_v35, 1  ;;  %v732_v58 = vrot.slane %v731_v45, 1  ;;  %v739_v59 = vrot.slane %v738_v46, 1  ;;  %v723_v60 = vrot.slane %v722_v42, 1 }
 0x613   :  { %v671_v61 = vrot.slane %v670_v48, 2  ;;  %v678_v62 = vrot.slane %v677_v49, 2  ;;  %v688_v63 = vrot.slane %v687_v50, 2  ;;  %v695_v0 = vrot.slane %v694_v51, 2 }
 0x614   :  { %v717_v1 = vadd.f32 %v716_v55, %v715_v35  ;;  %v733_v2 = vmax.f32 %v731_v45, %v732_v58  ;;  %v740_v3 = vmax.f32 %v738_v46, %v739_v59  ;;  %v724_v4 = vadd.f32 %v723_v60, %v722_v42 }
 0x615   :  { %v672_v5 = vadd.f32 %v671_v61, %v670_v48  ;;  %v679_v39 = vadd.f32 %v678_v62, %v677_v49  ;;  %v689_v6 = vmax.f32 %v687_v50, %v688_v63  ;;  %v696_v7 = vmax.f32 %v694_v51, %v695_v0 }
 0x616   :  { %v726_v8 = vmul.f32 0.0625, %v724_v4  ;;  %v725_v37 = vmul.f32 0.0625, %v717_v1  ;;  %v748_v17 = vrot.slane %v740_v3, 7  ;;  %v747_v18 = vrot.slane %v733_v2, 7 }
 0x617   :  { %v673_v9 = vrot.slane %v672_v5, 1  ;;  %v680_v10 = vrot.slane %v679_v39, 1  ;;  %v690_v11 = vrot.slane %v689_v6, 1  ;;  %v697_v12 = vrot.slane %v696_v7, 1 }
 0x618   :  { %v746_v21 = vrot.slane %v726_v8, 7  ;;  %v745_v56 = vrot.slane %v725_v37, 7  ;;  %v1243_v59 = vlaneseq  ;;  %v1257_v37 = vld [vmem:[#allocation5 + $0x10] sm:$0xff] }
 0x619   :  { %v674_v19 = vadd.f32 %v673_v9, %v672_v5  ;;  %v691_v47 = vmax.f32 %v689_v6, %v690_v11  ;;  %v698_v52 = vmax.f32 %v696_v7, %v697_v12  ;;  %v681_v20 = vadd.f32 %v680_v10, %v679_v39  ;;  %v1255_v6 = vld [vmem:[#allocation5] sm:$0xff]  ;;  %v1305_v10 = vld [vmem:[#allocation5 + $0x30] sm:$0xff] }
 0x61a   :  { %v1244_v60 = vshrl.u32 %v1243_v59, 7  ;;  %v1303_v9 = vld [vmem:[#allocation5 + $0x20] sm:$0xff] }
 0x61b   :  { %v683_v22 = vmul.f32 0.0625, %v674_v19  ;;  %v756_v23 = vsel %vm583_vm4, %v698_v52, %v748_v17  ;;  %v755_v27 = vsel %vm583_vm4, %v691_v47, %v747_v18  ;;  %v684_v28 = vmul.f32 0.0625, %v681_v20  ;;  %v1256_v47 = vld [vmem:[#allocation5 + $0x8] sm:$0xff] }
 0x61c   :  { %v760_v29 = vpack.c.bf16 %v756_v23, %v756_v23  ;;  %v759_v30 = vpack.c.bf16 %v755_v27, %v755_v27  ;;  %v1245_v1 = vsub.s32 0, %v1244_v60  ;;  %v1293_v2 = vsub.s32 1, %v1244_v60  ;;  %v1258_v23 = vld [vmem:[#allocation5 + $0x18] sm:$0xff]  ;;  %v1304_v27 = vld [vmem:[#allocation5 + $0x28] sm:$0xff] }
 0x61d   :  { %v754_v31 = vsel %vm583_vm4, %v684_v28, %v746_v21  ;;  %v753_v53 = vsel %vm583_vm4, %v683_v22, %v745_v56 }
 0x61e   :  { %1218 = vmatprep.mubr.bf16.mxu1 %v760_v29  ;;  %v758_v54 = vpack.c.bf16 %v754_v31, %v754_v31  ;;  %v757_v43 = vpack.c.bf16 %v753_v53, %v753_v53 }
 0x61f   :  { %1219 = vmatmul.mubr.bf16.vlgmr.msra.gmra.mxu1 %v759_v30 }
 0x620   :  { %1177 = vmatprep.mubr.bf16.mxu0 %v758_v54 }
 0x621   :  { %1178 = vmatmul.mubr.bf16.vlgmr.msra.gmra.mxu0 %v757_v43 }
 0x6df   :  { %v1220_v32 = vpop.f32.mrf.mxu1 }
 0x6e1   :  { %v1179_v34 = vpop.f32.mrf.mxu0  ;;  %v1222_v44 = vpop.f32.mrf.mxu1 }
 0x6e2   :  { %v1221_v36 = vadd.f32 %v1220_v32, %v1179_v34 }
 0x6e3   :  { %v1181_v33 = vpop.f32.mrf.mxu0  ;;  %v1224_v38 = vpop.f32.mrf.mxu1 }
 0x6e4   :  { %v1227_v40 = vsub.f32 0.0, %v1221_v36  ;;  %v1223_v41 = vadd.f32 %v1222_v44, %v1181_v33 }
 0x6e5   :  { %v1183_v35 = vpop.f32.mrf.mxu0  ;;  %v1225_v42 = vpop.f32.mrf.mxu1 }
 0x6e6   :  { %v1229_v45 = vmul.f32 1.442695, %v1227_v40  ;;  %v1228_v46 = vsub.f32 0.0, %v1223_v41 }
 0x6e7   :  { %v1184_v48 = vpop.f32.mrf.mxu0 }
 0x6e8   :  { %1676 = vpow2.f32 %v1229_v45  ;;  %v1231_v49 = vmul.f32 1.442695, %v1228_v46 }
 0x6ea   :  { %1678 = vpow2.f32 %v1231_v49 }
 0x6f5   :  { %v1677_v50 = vpop.eup %1676 }
 0x6f6   :  { %v1233_v51 = vadd.f32 1.0, %v1677_v50 }
 0x6f7   :  { %v1679_v55 = vpop.eup %1678 }
 0x6f8   :  { %1680 = vrcp.f32 %v1233_v51  ;;  %v1234_v58 = vadd.f32 1.0, %v1679_v55 }
 0x6fa   :  { %1682 = vrcp.f32 %v1234_v58 }
 0x705   :  { %v1681_v61 = vpop.eup %1680 }
 0x706   :  { %v1466_v62 = vadd.f32 -1.0, %v1681_v61 }
 0x707   :  { %v1683_v63 = vpop.eup %1682 }
 0x708   :  { %v1239_v0 = vmul.f32 0.0625, %v1466_v62  ;;  %v1467_v3 = vadd.f32 -1.0, %v1683_v63 }
 0x70a   :  { %v1241_v4 = vadd.f32 1.0, %v1239_v0  ;;  %v1240_v5 = vmul.f32 0.0625, %v1467_v3 }
 0x70c   :  { %v1246_v39 = vrot.slane %v1241_v4, %v1245_v1  ;;  %v1294_v7 = vrot.slane %v1241_v4, %v1293_v2  ;;  %v1242_v8 = vadd.f32 1.0, %v1240_v5 }
 0x70e   :  { %v1251_v11 = vmul.f32 %v1246_v39, %v1985_v25  ;;  %v1253_v12 = vmul.f32 %v1246_v39, %v1979_v57  ;;  %v1299_v17 = vmul.f32 %v1294_v7, %v1959_v13  ;;  %v1301_v18 = vmul.f32 %v1294_v7, %v1965_v15  ;;  %v1306_v25 = vld [vmem:[#allocation5 + $0x38] sm:$0xff] }
 0x70f   :  { %v1250_v19 = vrot.slane %v1242_v8, %v1245_v1  ;;  %v1298_v52 = vrot.slane %v1242_v8, %v1293_v2 }
 0x710   :  { %v2006_v20 = vadd.f32 %v1255_v6, %v1251_v11  ;;  %v2008_v21 = vadd.f32 %v1257_v37, %v1253_v12  ;;  %v2010_v56 = vadd.f32 %v1303_v9, %v1299_v17  ;;  %v2012_v22 = vadd.f32 %v1305_v10, %v1301_v18 }
 0x711   :  { %v1252_v57 = vmul.f32 %v1250_v19, %v1988_v26  ;;  %v1254_v13 = vmul.f32 %v1250_v19, %v1982_v24  ;;  %v1300_v15 = vmul.f32 %v1298_v52, %v1962_v14  ;;  %v1302_v28 = vmul.f32 %v1298_v52, %v1968_v16 }
 0x712   :  { %v1263_v29 = vsub.f32 0.0, %v2006_v20  ;;  %v1265_v30 = vsub.f32 0.0, %v2008_v21  ;;  %v1311_v31 = vsub.f32 0.0, %v2010_v56  ;;  %v1313_v53 = vsub.f32 0.0, %v2012_v22 }
 0x713   :  { %v1260_v54 = vadd.f32 %v1256_v47, %v1252_v57  ;;  %v2022_v43 = vadd.f32 %v1258_v23, %v1254_v13  ;;  %v2024_v32 = vadd.f32 %v1304_v27, %v1300_v15  ;;  %v2026_v26 = vadd.f32 %v1306_v25, %v1302_v28 }
 0x714   :  { %v1267_v24 = vmul.f32 1.442695, %v1263_v29  ;;  %v1271_v34 = vmul.f32 1.442695, %v1265_v30  ;;  %v1315_v14 = vmul.f32 1.442695, %v1311_v31 }
 0x715   :  { %v1319_v44 = vmul.f32 1.442695, %v1313_v53  ;;  %v1264_v16 = vsub.f32 0.0, %v1260_v54  ;;  %v1266_v36 = vsub.f32 0.0, %v2022_v43  ;;  %v1312_v33 = vsub.f32 0.0, %v2024_v32 }
 0x716   :  { %1684 = vpow2.f32 %v1267_v24  ;;  %v1314_v38 = vsub.f32 0.0, %v2026_v26 }
 0x717   :  { %1686 = vpow2.f32 %v1271_v34  ;;  %v1269_v40 = vmul.f32 1.442695, %v1264_v16  ;;  %v1273_v41 = vmul.f32 1.442695, %v1266_v36  ;;  %v1317_v35 = vmul.f32 1.442695, %v1312_v33 }
 0x718   :  { %1688 = vpow2.f32 %v1315_v14  ;;  %v1321_v42 = vmul.f32 1.442695, %v1314_v38 }
 0x719   :  { %1690 = vpow2.f32 %v1319_v44 }
 0x71a   :  { %1692 = vpow2.f32 %v1269_v40 }
 0x71b   :  { %1694 = vpow2.f32 %v1273_v41 }
 0x71c   :  { %1696 = vpow2.f32 %v1317_v35 }
 0x71d   :  { %1698 = vpow2.f32 %v1321_v42 }
 0x723   :  { %v1685_v45 = vpop.eup %1684 }
 0x724   :  { %v1687_v46 = vpop.eup %1686  ;;  %v1275_v48 = vadd.f32 1.0, %v1685_v45 }
 0x725   :  { %v1689_v49 = vpop.eup %1688  ;;  %v1277_v50 = vadd.f32 1.0, %v1687_v46 }
 0x726   :  { %v1691_v51 = vpop.eup %1690  ;;  %1700 = vrcp.f32 %v1275_v48  ;;  %v1323_v55 = vadd.f32 1.0, %v1689_v49 }
 0x727   :  { %v1693_v58 = vpop.eup %1692  ;;  %1702 = vrcp.f32 %v1277_v50  ;;  %v1325_v59 = vadd.f32 1.0, %v1691_v51 }
 0x728   :  { %v1695_v60 = vpop.eup %1694  ;;  %1704 = vrcp.f32 %v1323_v55  ;;  %v1276_v61 = vadd.f32 1.0, %v1693_v58 }
 0x729   :  { %v1697_v62 = vpop.eup %1696  ;;  %1706 = vrcp.f32 %v1325_v59  ;;  %v1278_v63 = vadd.f32 1.0, %v1695_v60 }
 0x72a   :  { %v1699_v0 = vpop.eup %1698  ;;  %1708 = vrcp.f32 %v1276_v61  ;;  %v1324_v1 = vadd.f32 1.0, %v1697_v62 }
 0x72b   :  { %1710 = vrcp.f32 %v1278_v63  ;;  %v1326_v2 = vadd.f32 1.0, %v1699_v0 }
 0x72c   :  { %1712 = vrcp.f32 %v1324_v1 }
 0x72d   :  { %1714 = vrcp.f32 %v1326_v2 }
 0x733   :  { %v1701_v3 = vpop.eup %1700 }
 0x734   :  { %v1703_v4 = vpop.eup %1702  ;;  %v1283_v5 = vmul.f32 %v1701_v3, %v2006_v20 }
 0x735   :  { %v1705_v39 = vpop.eup %1704  ;;  %v1285_v6 = vmul.f32 %v1703_v4, %v2008_v21 }
 0x736   :  { %v1707_v7 = vpop.eup %1706  ;;  %1287 = vst [vmem:[#allocation8] sm:$0xff] %v1283_v5  ;;  %v1331_v8 = vmul.f32 %v1705_v39, %v2010_v56 }
 0x737   :  { %v1709_v37 = vpop.eup %1708  ;;  %1289 = vst [vmem:[#allocation8 + $0x10] sm:$0xff] %v1285_v6  ;;  %v1333_v9 = vmul.f32 %v1707_v7, %v2012_v22 }
 0x738   :  { %v1711_v10 = vpop.eup %1710  ;;  %1335 = vst [vmem:[#allocation8 + $0x20] sm:$0xff] %v1331_v8  ;;  %v1284_v11 = vmul.f32 %v1709_v37, %v1260_v54 }
 0x739   :  { %v1713_v12 = vpop.eup %1712  ;;  %1337 = vst [vmem:[#allocation8 + $0x30] sm:$0xff] %v1333_v9  ;;  %v1286_v17 = vmul.f32 %v1711_v10, %v2022_v43 }
 0x73a   :  { %v1715_v18 = vpop.eup %1714  ;;  %1288 = vst [vmem:[#allocation8 + $0x8] sm:$0xff] %v1284_v11  ;;  %v1332_v19 = vmul.f32 %v1713_v12, %v2024_v32 }
 0x73b   :  { %1290 = vst [vmem:[#allocation8 + $0x18] sm:$0xff] %v1286_v17  ;;  %v1334_v47 = vmul.f32 %v1715_v18, %v2026_v26 }
 0x73c   :  { %1336 = vst [vmem:[#allocation8 + $0x28] sm:$0xff] %v1332_v19 }
 0x73d   :  { %1338 = vst [vmem:[#allocation8 + $0x38] sm:$0xff] %v1334_v47 }
 0x73e   :  { %1787 = shalt.err (!%p1784_p5)
}
 0x73f   :  { %1350 = dma.vmem_to_hbm [thread:$0]  %s1345_s15, 1024, %s2052_s8, [#allocation4], %s1804_s10, %s1804_s10, %s1805_s11  }
 0x740   :  { %1800 = dma.done.wait [#allocation4], 1024  }
 0x741   :  { %1801 = vsyncadd [#allocation4], 4294966272 }
 0x742   :  { %1354 = vsyncpa [#allocation3], 1 }
 0x743   :  { %1355 = vsyncpa [#allocation6], 1 }
 0x744   :  { %1356 = vsyncpa [#allocation4], 1 }

</bundles_post_ra>
